<compile_context>
chip_gen: v7x
topology: tpu7x:2x2x1
jax: 0.10.0
libtpu: 0.0.40
codegen_flags: <defaults>
</compile_context>

<pallas_src>
import functools

import jax
import jax.numpy as jnp
from jax import lax
from jax.experimental import pallas as pl
from jax.experimental.pallas import tpu as pltpu

LEAKY_SLOPE = 0.1
BN_EPS = 1e-5


def convgru_kernel(x_ref, wmask_ref, wcat_ref, bcat_ref, o_ref, *, W):
    """Whole batch in one step: x_ref is (C, N*H*W), channels-first, lane-dense."""
    C = x_ref.shape[0]
    NM = x_ref.shape[1]
    Cout = bcat_ref.shape[0] - 2 * C

    x = x_ref[...]                                           # (C, NM) f32
    x_bf = x.astype(jnp.bfloat16)

    # Stacked weights / biases (BN already folded): [w1; w2; w3], [b1; b2; b3].
    w12 = wcat_ref[0:2 * C, :]                               # (2C, C) bf16
    w2 = wcat_ref[C:2 * C, :]                                # (C, C)  bf16
    w3 = wcat_ref[2 * C:2 * C + Cout, :]                     # (Cout, C) bf16
    b12 = bcat_ref[0:2 * C, :]                               # (2C, 1) f32
    b3 = bcat_ref[2 * C:2 * C + Cout, :]                     # (Cout, 1) f32

    # Gate-independent product, hoisted off the dependency chain:
    #   out = w3 @ x_t + b3 = w3 @ leaky(y2) + w3 @ x + b3.
    # Lets the MXU work overlap the VPU/XLU-bound attention phase below.
    w3x = jnp.dot(w3, x_bf, preferred_element_type=jnp.float32)   # (Cout, NM)

    # ---- SpatialAttention ----------------------------------------------------
    # Channel mean / max: VPU pre-reduce over 8-sublane slabs, then one small
    # XLU sublane reduce.
    if C % 8 == 0 and C > 8:
        ssum = x[0:8, :]
        smax = x[0:8, :]
        for c0 in range(8, C, 8):
            blk = x[c0:c0 + 8, :]
            ssum = ssum + blk
            smax = jnp.maximum(smax, blk)
    else:
        ssum, smax = x, x
    avg = jnp.sum(ssum, axis=0, keepdims=True) * (1.0 / C)        # (1, NM)
    mx = jnp.max(smax, axis=0, keepdims=True)                     # (1, NM)
    am = jnp.concatenate([avg, mx], axis=0)                       # (2, NM)

    # 3x3 conv over the fused (avg, max) plane: 8 lane rolls (XLU) + center tap.
    # wmask_ref[k] = tap weight (per plane) * validity mask; invalid taps
    # (image edges, batch seam, roll wrap) are zeroed by the mask.
    acc = wmask_ref[4] * am                                       # center tap
    k = 0
    for dy in (-1, 0, 1):
        for dx in (-1, 0, 1):
            o = dy * W + dx
            if o != 0:
                shifted = pltpu.roll(am, shift=(-o) % NM, axis=1)  # out[l]=am[l+o]
                acc = acc + wmask_ref[k] * shifted
            k += 1
    logit = jnp.sum(acc, axis=0, keepdims=True)                   # (1, NM)
    ga = jax.nn.sigmoid(logit)                                    # (1, NM)

    # ---- gated 1x1-conv chain (BN folded; bf16 MXU operands, f32 math) -------
    x_c = ga * x                                                  # (C, NM)
    y12 = jnp.dot(w12, x_c.astype(jnp.bfloat16),
                  preferred_element_type=jnp.float32) + b12       # (2C, NM)
    y1 = y12[0:C, :]                                              # w1@x_c + b1
    w2xc = y12[C:2 * C, :]                                        # w2@x_c + b2
    x_b = jnp.maximum(y1, LEAKY_SLOPE * y1) * (1.0 - ga)          # (C, NM)
    y2 = jnp.dot(w2, x_b.astype(jnp.bfloat16),
                 preferred_element_type=jnp.float32) + w2xc       # conv_a2 pre-act
    y2a = jnp.maximum(y2, LEAKY_SLOPE * y2)
    out = jnp.dot(w3, y2a.astype(jnp.bfloat16),
                  preferred_element_type=jnp.float32) + w3x + b3  # conv_a3
    o_ref[...] = out.astype(o_ref.dtype)


def prepare_params(raw, N, H, W):
    """Fold BN into the 1x1 convs, stack weights, build weighted tap masks."""
    def fold(w, bn):
        gamma, beta, mean, var = bn
        s = gamma * lax.rsqrt(var + BN_EPS)
        return w * s[:, None], beta - mean * s

    w1p, b1 = fold(raw["w1"], raw["bn1"])
    w2p, b2 = fold(raw["w2"], raw["bn2"])

    # [w1; w2; w3] stacked: one DMA, and the kernel gets w1@x_c and w2@x_c from
    # a single (2C,C)@(C,NM) matmul.  bf16 = MXU-native operands.
    wcat = jnp.concatenate([w1p, w2p, raw["w3"]], axis=0).astype(jnp.bfloat16)
    bcat = jnp.concatenate([b1, b2, raw["b3"]], axis=0)[:, None].astype(jnp.float32)

    # SpatialAttention 3x3 weights (PyTorch (1,2,3,3) = [out, (avg,max), ky, kx])
    # folded into per-tap validity masks over the fused (batch, row, col) lane
    # axis.  Row masks are computed per batch element, so dy=+-1 taps never
    # bleed across the batch seam or the roll wrap-around.
    wp = raw["sa_w"].reshape(2, 3, 3).astype(jnp.float32)         # (plane, ky, kx)
    M = H * W
    lane = jnp.arange(N * M)
    row = (lane % M) // W
    col = lane % W
    tap_tables = []
    for iy, dy in enumerate((-1, 0, 1)):
        for ix, dx in enumerate((-1, 0, 1)):
            valid = ((row + dy >= 0) & (row + dy < H) &
                     (col + dx >= 0) & (col + dx < W)).astype(jnp.float32)
            tap_tables.append(wp[:, iy, ix][:, None] * valid[None, :])   # (2, NM)
    wmask = jnp.stack(tap_tables, axis=0)                                # (9, 2, NM)

    return dict(wcat=wcat, bcat=bcat, wmask=wmask)


def convgru_forward(x_nchw, kp):
    N, C, H, W = x_nchw.shape
    M = H * W
    NM = N * M
    Cout = kp["bcat"].shape[0] - 2 * C

    # Channels-first with the batch fused into the lane dim: (C, N*H*W).
    # The NCHW -> (C, N*M) transpose is a tiny one-off XLA op outside the kernel.
    x_flat = jnp.transpose(x_nchw.reshape(N, C, M), (1, 0, 2)).reshape(C, NM)

    def vspec(a):
        nd = a.ndim
        return pl.BlockSpec(a.shape, lambda n, nd=nd: (0,) * nd)

    out_flat = pl.pallas_call(
        functools.partial(convgru_kernel, W=W),
        out_shape=jax.ShapeDtypeStruct((Cout, NM), jnp.float32),
        grid=(1,),                                        # single fused step
        in_specs=[vspec(x_flat),                          # x          (C, NM)
                  vspec(kp["wmask"]),                     # tap table  (9, 2, NM)
                  vspec(kp["wcat"]),                      # [w1;w2;w3] (2C+Cout, C)
                  vspec(kp["bcat"])],                     # [b1;b2;b3] (2C+Cout, 1)
        out_specs=pl.BlockSpec((Cout, NM), lambda n: (0, 0)),
        compiler_params=pltpu.CompilerParams(
            dimension_semantics=("arbitrary",)),
    )(x_flat, kp["wmask"], kp["wcat"], kp["bcat"])

    return jnp.transpose(out_flat.reshape(Cout, N, M),
                         (1, 0, 2)).reshape(N, Cout, H, W)


def ref_forward(x, p):
    """Pure-JAX NCHW reference mirroring the PyTorch module (eval-mode BN)."""
    x = x.astype(jnp.float32)
    avg = jnp.mean(x, axis=1, keepdims=True)
    mx = jnp.max(x, axis=1, keepdims=True)
    a = jnp.concatenate([avg, mx], axis=1)                          # (N,2,H,W)
    logit = lax.conv_general_dilated(
        a, p["sa_w"], window_strides=(1, 1), padding="SAME",
        dimension_numbers=("NCHW", "OIHW", "NCHW"))
    ga = jax.nn.sigmoid(logit)                                      # (N,1,H,W)
    x_c = ga * x

    def cba(z, w, bn):
        y = jnp.einsum("oc,nchw->nohw", w, z)
        gamma, beta, mean, var = bn
        s = gamma * lax.rsqrt(var + BN_EPS)
        y = (y - mean[None, :, None, None]) * s[None, :, None, None] \
            + beta[None, :, None, None]
        return jnp.where(y > 0, y, LEAKY_SLOPE * y)

    x_b = cba(x_c, p["w1"], p["bn1"]) * (1.0 - ga)
    x_t = cba(x_b + x_c, p["w2"], p["bn2"]) + x
    return jnp.einsum("oc,nchw->nohw", p["w3"], x_t) + p["b3"][None, :, None, None]


if __name__ == "__main__":
    N, C, H, W, Cout = 2, 32, 16, 16, 32

    key = jax.random.PRNGKey(0)
    ks = jax.random.split(key, 16)

    x = jax.random.normal(ks[0], (N, C, H, W), jnp.float32)   # PyTorch NCHW

    def rand_bn(i, c):
        gamma = 1.0 + 0.1 * jax.random.normal(ks[i], (c,), jnp.float32)
        beta = 0.1 * jax.random.normal(ks[i + 1], (c,), jnp.float32)
        mean = 0.1 * jax.random.normal(ks[i + 2], (c,), jnp.float32)
        var = 1.0 + 0.1 * jax.random.uniform(ks[i + 3], (c,), jnp.float32)
        return (gamma, beta, mean, var)

    raw = dict(
        sa_w=0.2 * jax.random.normal(ks[1], (1, 2, 3, 3), jnp.float32),
        w1=jax.random.normal(ks[2], (C, C), jnp.float32) / jnp.sqrt(C),
        bn1=rand_bn(3, C),
        w2=jax.random.normal(ks[7], (C, C), jnp.float32) / jnp.sqrt(C),
        bn2=rand_bn(8, C),
        w3=jax.random.normal(ks[12], (Cout, C), jnp.float32) / jnp.sqrt(C),
        b3=0.1 * jax.random.normal(ks[13], (Cout,), jnp.float32),
    )

    kp = prepare_params(raw, N, H, W)

    out = jax.block_until_ready(convgru_forward(x, kp))
    ref = ref_forward(x, raw)

    assert out.shape == (N, Cout, H, W), out.shape
    # Tolerance budget: bf16 MXU operands over three chained 32-deep dots
    # (~1e-2 worst case); any indexing/mask/roll bug would be O(0.1+).
    max_err = float(jnp.max(jnp.abs(out - ref)))
    assert jnp.allclose(out, ref, rtol=2e-2, atol=3e-2), f"max abs err {max_err}"

    print("KERNEL_OK")
</pallas_src>

<mosaic_0001>
module attributes {stable_mosaic.version = 11 : i64} {
  func.func @convgru_kernel(%arg0: i32, %arg1: memref<32x512xf32, #tpu.memory_space<vmem>>, %arg2: memref<9x2x512xf32, #tpu.memory_space<vmem>>, %arg3: memref<96x32xbf16, #tpu.memory_space<vmem>>, %arg4: memref<96x1xf32, #tpu.memory_space<vmem>>, %arg5: memref<32x512xf32, #tpu.memory_space<vmem>>) attributes {dimension_semantics = [#tpu.dimension_semantics<arbitrary>], iteration_bounds = array<i64: 1>, scalar_prefetch = 0 : i64, scratch_operands = 0 : i64, tpu.core_type = #tpu.core_type<tc>, window_params = [{pipeline_mode = #tpu.pipeline_mode<synchronous>, transform_indices = @transform_0, window_bounds = array<i64: 32, 512>}, {pipeline_mode = #tpu.pipeline_mode<synchronous>, transform_indices = @transform_1, window_bounds = array<i64: 9, 2, 512>}, {pipeline_mode = #tpu.pipeline_mode<synchronous>, transform_indices = @transform_2, window_bounds = array<i64: 96, 32>}, {pipeline_mode = #tpu.pipeline_mode<synchronous>, transform_indices = @transform_3, window_bounds = array<i64: 96, 1>}, {pipeline_mode = #tpu.pipeline_mode<synchronous>, transform_indices = @transform_4, window_bounds = array<i64: 32, 512>}]} {
    %c0 = arith.constant 0 : index
    %c0_0 = arith.constant 0 : index
    %0 = vector.load %arg1[%c0, %c0_0] : memref<32x512xf32, #tpu.memory_space<vmem>>, vector<32x512xf32>
    %1 = arith.truncf %0 : vector<32x512xf32> to vector<32x512xbf16>
    %c0_1 = arith.constant 0 : index
    %c0_2 = arith.constant 0 : index
    %2 = vector.load %arg3[%c0_1, %c0_2] : memref<96x32xbf16, #tpu.memory_space<vmem>>, vector<64x32xbf16>
    %c32 = arith.constant 32 : index
    %c0_3 = arith.constant 0 : index
    %3 = vector.load %arg3[%c32, %c0_3] : memref<96x32xbf16, #tpu.memory_space<vmem>>, vector<32x32xbf16>
    %c64 = arith.constant 64 : index
    %c0_4 = arith.constant 0 : index
    %4 = vector.load %arg3[%c64, %c0_4] : memref<96x32xbf16, #tpu.memory_space<vmem>>, vector<32x32xbf16>
    %c0_5 = arith.constant 0 : index
    %c0_6 = arith.constant 0 : index
    %5 = vector.load %arg4[%c0_5, %c0_6] : memref<96x1xf32, #tpu.memory_space<vmem>>, vector<64x1xf32>
    %c64_7 = arith.constant 64 : index
    %c0_8 = arith.constant 0 : index
    %6 = vector.load %arg4[%c64_7, %c0_8] : memref<96x1xf32, #tpu.memory_space<vmem>>, vector<32x1xf32>
    %cst = arith.constant dense<0.000000e+00> : vector<32x512xf32>
    %7 = tpu.matmul %4, %1, %cst {dimension_numbers = #tpu.dot_dimension_numbers<[1], [0], [0], [1], [0, 0, 1, 1], [], []>} : vector<32x32xbf16>, vector<32x512xbf16>, vector<32x512xf32> -> vector<32x512xf32>
    %8 = vector.extract_strided_slice %0 {offsets = [0, 0], sizes = [8, 512], strides = [1, 1]} : vector<32x512xf32> to vector<8x512xf32>
    %9 = vector.extract_strided_slice %0 {offsets = [0, 0], sizes = [8, 512], strides = [1, 1]} : vector<32x512xf32> to vector<8x512xf32>
    %10 = vector.extract_strided_slice %0 {offsets = [8, 0], sizes = [8, 512], strides = [1, 1]} : vector<32x512xf32> to vector<8x512xf32>
    %11 = arith.addf %8, %10 : vector<8x512xf32>
    %12 = arith.maximumf %9, %10 : vector<8x512xf32>
    %13 = vector.extract_strided_slice %0 {offsets = [16, 0], sizes = [8, 512], strides = [1, 1]} : vector<32x512xf32> to vector<8x512xf32>
    %14 = arith.addf %11, %13 : vector<8x512xf32>
    %15 = arith.maximumf %12, %13 : vector<8x512xf32>
    %16 = vector.extract_strided_slice %0 {offsets = [24, 0], sizes = [8, 512], strides = [1, 1]} : vector<32x512xf32> to vector<8x512xf32>
    %17 = arith.addf %14, %16 : vector<8x512xf32>
    %18 = arith.maximumf %15, %16 : vector<8x512xf32>
    %cst_9 = arith.constant dense<0.000000e+00> : vector<512xf32>
    %19 = vector.multi_reduction <add>, %17, %cst_9 [0] : vector<8x512xf32> to vector<512xf32>
    %20 = vector.shape_cast %19 : vector<512xf32> to vector<1x512xf32>
    %cst_10 = arith.constant 3.125000e-02 : f32
    %21 = vector.broadcast %cst_10 : f32 to vector<1x512xf32>
    %22 = arith.mulf %20, %21 : vector<1x512xf32>
    %cst_11 = arith.constant dense<0xFF800000> : vector<512xf32>
    %23 = vector.multi_reduction <maximumf>, %18, %cst_11 [0] : vector<8x512xf32> to vector<512xf32>
    %24 = vector.shape_cast %23 : vector<512xf32> to vector<1x512xf32>
    %25 = tpu.concatenate %22, %24 in 0 : vector<1x512xf32>, vector<1x512xf32> -> vector<2x512xf32>
    %c4 = arith.constant 4 : index
    %c0_12 = arith.constant 0 : index
    %c0_13 = arith.constant 0 : index
    %26 = vector.load %arg2[%c4, %c0_12, %c0_13] : memref<9x2x512xf32, #tpu.memory_space<vmem>>, vector<1x2x512xf32>
    %27 = vector.shape_cast %26 : vector<1x2x512xf32> to vector<2x512xf32>
    %28 = arith.mulf %27, %25 : vector<2x512xf32>
    %c17_i32 = arith.constant 17 : i32
    %29 = tpu.dynamic_rotate %25 by %c17_i32 dim 1 : vector<2x512xf32>, i32 -> vector<2x512xf32>
    %c0_14 = arith.constant 0 : index
    %c0_15 = arith.constant 0 : index
    %c0_16 = arith.constant 0 : index
    %30 = vector.load %arg2[%c0_14, %c0_15, %c0_16] : memref<9x2x512xf32, #tpu.memory_space<vmem>>, vector<1x2x512xf32>
    %31 = vector.shape_cast %30 : vector<1x2x512xf32> to vector<2x512xf32>
    %32 = arith.mulf %31, %29 : vector<2x512xf32>
    %33 = arith.addf %28, %32 : vector<2x512xf32>
    %c16_i32 = arith.constant 16 : i32
    %34 = tpu.dynamic_rotate %25 by %c16_i32 dim 1 : vector<2x512xf32>, i32 -> vector<2x512xf32>
    %c1 = arith.constant 1 : index
    %c0_17 = arith.constant 0 : index
    %c0_18 = arith.constant 0 : index
    %35 = vector.load %arg2[%c1, %c0_17, %c0_18] : memref<9x2x512xf32, #tpu.memory_space<vmem>>, vector<1x2x512xf32>
    %36 = vector.shape_cast %35 : vector<1x2x512xf32> to vector<2x512xf32>
    %37 = arith.mulf %36, %34 : vector<2x512xf32>
    %38 = arith.addf %33, %37 : vector<2x512xf32>
    %c15_i32 = arith.constant 15 : i32
    %39 = tpu.dynamic_rotate %25 by %c15_i32 dim 1 : vector<2x512xf32>, i32 -> vector<2x512xf32>
    %c2 = arith.constant 2 : index
    %c0_19 = arith.constant 0 : index
    %c0_20 = arith.constant 0 : index
    %40 = vector.load %arg2[%c2, %c0_19, %c0_20] : memref<9x2x512xf32, #tpu.memory_space<vmem>>, vector<1x2x512xf32>
    %41 = vector.shape_cast %40 : vector<1x2x512xf32> to vector<2x512xf32>
    %42 = arith.mulf %41, %39 : vector<2x512xf32>
    %43 = arith.addf %38, %42 : vector<2x512xf32>
    %c1_i32 = arith.constant 1 : i32
    %44 = tpu.dynamic_rotate %25 by %c1_i32 dim 1 : vector<2x512xf32>, i32 -> vector<2x512xf32>
    %c3 = arith.constant 3 : index
    %c0_21 = arith.constant 0 : index
    %c0_22 = arith.constant 0 : index
    %45 = vector.load %arg2[%c3, %c0_21, %c0_22] : memref<9x2x512xf32, #tpu.memory_space<vmem>>, vector<1x2x512xf32>
    %46 = vector.shape_cast %45 : vector<1x2x512xf32> to vector<2x512xf32>
    %47 = arith.mulf %46, %44 : vector<2x512xf32>
    %48 = arith.addf %43, %47 : vector<2x512xf32>
    %c511_i32 = arith.constant 511 : i32
    %49 = tpu.dynamic_rotate %25 by %c511_i32 dim 1 : vector<2x512xf32>, i32 -> vector<2x512xf32>
    %c5 = arith.constant 5 : index
    %c0_23 = arith.constant 0 : index
    %c0_24 = arith.constant 0 : index
    %50 = vector.load %arg2[%c5, %c0_23, %c0_24] : memref<9x2x512xf32, #tpu.memory_space<vmem>>, vector<1x2x512xf32>
    %51 = vector.shape_cast %50 : vector<1x2x512xf32> to vector<2x512xf32>
    %52 = arith.mulf %51, %49 : vector<2x512xf32>
    %53 = arith.addf %48, %52 : vector<2x512xf32>
    %c497_i32 = arith.constant 497 : i32
    %54 = tpu.dynamic_rotate %25 by %c497_i32 dim 1 : vector<2x512xf32>, i32 -> vector<2x512xf32>
    %c6 = arith.constant 6 : index
    %c0_25 = arith.constant 0 : index
    %c0_26 = arith.constant 0 : index
    %55 = vector.load %arg2[%c6, %c0_25, %c0_26] : memref<9x2x512xf32, #tpu.memory_space<vmem>>, vector<1x2x512xf32>
    %56 = vector.shape_cast %55 : vector<1x2x512xf32> to vector<2x512xf32>
    %57 = arith.mulf %56, %54 : vector<2x512xf32>
    %58 = arith.addf %53, %57 : vector<2x512xf32>
    %c496_i32 = arith.constant 496 : i32
    %59 = tpu.dynamic_rotate %25 by %c496_i32 dim 1 : vector<2x512xf32>, i32 -> vector<2x512xf32>
    %c7 = arith.constant 7 : index
    %c0_27 = arith.constant 0 : index
    %c0_28 = arith.constant 0 : index
    %60 = vector.load %arg2[%c7, %c0_27, %c0_28] : memref<9x2x512xf32, #tpu.memory_space<vmem>>, vector<1x2x512xf32>
    %61 = vector.shape_cast %60 : vector<1x2x512xf32> to vector<2x512xf32>
    %62 = arith.mulf %61, %59 : vector<2x512xf32>
    %63 = arith.addf %58, %62 : vector<2x512xf32>
    %c495_i32 = arith.constant 495 : i32
    %64 = tpu.dynamic_rotate %25 by %c495_i32 dim 1 : vector<2x512xf32>, i32 -> vector<2x512xf32>
    %c8 = arith.constant 8 : index
    %c0_29 = arith.constant 0 : index
    %c0_30 = arith.constant 0 : index
    %65 = vector.load %arg2[%c8, %c0_29, %c0_30] : memref<9x2x512xf32, #tpu.memory_space<vmem>>, vector<1x2x512xf32>
    %66 = vector.shape_cast %65 : vector<1x2x512xf32> to vector<2x512xf32>
    %67 = arith.mulf %66, %64 : vector<2x512xf32>
    %68 = arith.addf %63, %67 : vector<2x512xf32>
    %cst_31 = arith.constant dense<0.000000e+00> : vector<512xf32>
    %69 = vector.multi_reduction <add>, %68, %cst_31 [0] : vector<2x512xf32> to vector<512xf32>
    %70 = vector.shape_cast %69 : vector<512xf32> to vector<1x512xf32>
    %71 = arith.negf %70 : vector<1x512xf32>
    %72 = math.exp %71 : vector<1x512xf32>
    %cst_32 = arith.constant 1.000000e+00 : f32
    %73 = vector.broadcast %cst_32 : f32 to vector<1x512xf32>
    %74 = arith.addf %73, %72 : vector<1x512xf32>
    %75 = arith.divf %73, %74 : vector<1x512xf32>
    %76 = vector.broadcast %75 : vector<1x512xf32> to vector<32x512xf32>
    %77 = arith.mulf %76, %0 : vector<32x512xf32>
    %78 = arith.truncf %77 : vector<32x512xf32> to vector<32x512xbf16>
    %cst_33 = arith.constant dense<0.000000e+00> : vector<64x512xf32>
    %79 = tpu.matmul %2, %78, %cst_33 {dimension_numbers = #tpu.dot_dimension_numbers<[1], [0], [0], [1], [0, 0, 1, 1], [], []>} : vector<64x32xbf16>, vector<32x512xbf16>, vector<64x512xf32> -> vector<64x512xf32>
    %80 = vector.broadcast %5 : vector<64x1xf32> to vector<64x512xf32>
    %81 = arith.addf %79, %80 : vector<64x512xf32>
    %82 = vector.extract_strided_slice %81 {offsets = [0, 0], sizes = [32, 512], strides = [1, 1]} : vector<64x512xf32> to vector<32x512xf32>
    %83 = vector.extract_strided_slice %81 {offsets = [32, 0], sizes = [32, 512], strides = [1, 1]} : vector<64x512xf32> to vector<32x512xf32>
    %cst_34 = arith.constant 1.000000e-01 : f32
    %84 = vector.broadcast %cst_34 : f32 to vector<32x512xf32>
    %85 = arith.mulf %84, %82 : vector<32x512xf32>
    %86 = arith.maximumf %82, %85 : vector<32x512xf32>
    %cst_35 = arith.constant 1.000000e+00 : f32
    %87 = vector.broadcast %cst_35 : f32 to vector<1x512xf32>
    %88 = arith.subf %87, %75 : vector<1x512xf32>
    %89 = vector.broadcast %88 : vector<1x512xf32> to vector<32x512xf32>
    %90 = arith.mulf %86, %89 : vector<32x512xf32>
    %91 = arith.truncf %90 : vector<32x512xf32> to vector<32x512xbf16>
    %cst_36 = arith.constant dense<0.000000e+00> : vector<32x512xf32>
    %92 = tpu.matmul %3, %91, %cst_36 {dimension_numbers = #tpu.dot_dimension_numbers<[1], [0], [0], [1], [0, 0, 1, 1], [], []>} : vector<32x32xbf16>, vector<32x512xbf16>, vector<32x512xf32> -> vector<32x512xf32>
    %93 = arith.addf %92, %83 : vector<32x512xf32>
    %cst_37 = arith.constant 1.000000e-01 : f32
    %94 = vector.broadcast %cst_37 : f32 to vector<32x512xf32>
    %95 = arith.mulf %94, %93 : vector<32x512xf32>
    %96 = arith.maximumf %93, %95 : vector<32x512xf32>
    %97 = arith.truncf %96 : vector<32x512xf32> to vector<32x512xbf16>
    %cst_38 = arith.constant dense<0.000000e+00> : vector<32x512xf32>
    %98 = tpu.matmul %4, %97, %cst_38 {dimension_numbers = #tpu.dot_dimension_numbers<[1], [0], [0], [1], [0, 0, 1, 1], [], []>} : vector<32x32xbf16>, vector<32x512xbf16>, vector<32x512xf32> -> vector<32x512xf32>
    %99 = arith.addf %98, %7 : vector<32x512xf32>
    %100 = vector.broadcast %6 : vector<32x1xf32> to vector<32x512xf32>
    %101 = arith.addf %99, %100 : vector<32x512xf32>
    %c0_39 = arith.constant 0 : index
    %c0_40 = arith.constant 0 : index
    %102 = vector.load %arg5[%c0_39, %c0_40] : memref<32x512xf32, #tpu.memory_space<vmem>>, vector<32x512xf32>
    tpu.vector_store %arg5[%c0_39, %c0_40], %101 {strides = array<i32>} : memref<32x512xf32, #tpu.memory_space<vmem>>, vector<32x512xf32>,
    return
  }
  func.func @transform_0(%arg0: i32) -> (i32, i32) {
    %c0_i32 = arith.constant 0 : i32
    %c0_i32_0 = arith.constant 0 : i32
    %c0_i32_1 = arith.constant 0 : i32
    return %c0_i32, %c0_i32_0 : i32, i32
  }
  func.func @transform_1(%arg0: i32) -> (i32, i32, i32) {
    %c0_i32 = arith.constant 0 : i32
    %c0_i32_0 = arith.constant 0 : i32
    %c0_i32_1 = arith.constant 0 : i32
    %c0_i32_2 = arith.constant 0 : i32
    return %c0_i32, %c0_i32_0, %c0_i32_1 : i32, i32, i32
  }
  func.func @transform_2(%arg0: i32) -> (i32, i32) {
    %c0_i32 = arith.constant 0 : i32
    %c0_i32_0 = arith.constant 0 : i32
    %c0_i32_1 = arith.constant 0 : i32
    return %c0_i32, %c0_i32_0 : i32, i32
  }
  func.func @transform_3(%arg0: i32) -> (i32, i32) {
    %c0_i32 = arith.constant 0 : i32
    %c0_i32_0 = arith.constant 0 : i32
    %c0_i32_1 = arith.constant 0 : i32
    return %c0_i32, %c0_i32_0 : i32, i32
  }
  func.func @transform_4(%arg0: i32) -> (i32, i32) {
    %c0_i32 = arith.constant 0 : i32
    %c0_i32_0 = arith.constant 0 : i32
    %c0_i32_1 = arith.constant 0 : i32
    return %c0_i32, %c0_i32_0 : i32, i32
  }
}

</mosaic_0001>

<bundles_post_ra>
// kernel: tpu_custom_call.1
= control target key start
LH: loop header
LB: loop body
LE: loop exit
PB: predicated region body
PF: predicated region fallthrough
CT: control target
= control target key end

     0   :  { %9 = vsyncpa [#allocation3], 0  ;;  %s1912_s0 = inlined_call_operand.vmem [shape: f32[32,512], index: 0, kind: input, shape index: {}]   ;;  %s1913_s1 = inlined_call_operand.hbm [shape: f32[9,2,512], index: 1, kind: input, shape index: {}]   ;;  %s1914_s2 = inlined_call_operand.vmem [shape: bf16[96,32], index: 2, kind: input, shape index: {}]   ;;  %s1915_s3 = inlined_call_operand.vmem [shape: f32[96,1], index: 3, kind: input, shape index: {}]   ;;  %s1916_s4 = inlined_call_operand.hbm [shape: f32[32,512], index: 4, kind: output, shape index: {}]  }
   0x1   :  { %10 = vsyncpa [#allocation4], 0  ;;  %s1487_s15 = smov [#allocation2]   ;;  %s1439_s19 = scalar_lea.hbm %s1913_s1, 1152 }
   0x2   :  { %s18_s16 = sshll.u32 %s1487_s15, 4  ;;  %p1440_p0 = scmp.ne.s32.totalorder %s1913_s1, %s1439_s19  ;;  %s19_s16 = int_to_ptr.vmem [resolvable:$true] %s18_s16 }
   0x3   :  { %p1443_p1 = scmp.lt.u32.totalorder %s1439_s19, %s1913_s1 }
   0x5   :  { %p1445_p2 = pnand %p1443_p1, %p1440_p0 }
   0x7   :  { %1448 = shalt.err (!%p1445_p2)
}
   0x8   :  { %s1449_s24 = scalar_lea.vmem %s19_s16, 1152  ;;  %p1454_p4 = scmp.lt.s32.totalorder %s19_s16, %s19_s16 }
   0x9   :  { %p1450_p3 = scmp.ne.s32.totalorder %s19_s16, %s1449_s24  ;;  %p1455_p5 = scmp.lt.s32.totalorder %s1449_s24, %s1449_s24 }
   0xb   :  { %p1456_p6 = por %p1455_p5, %p1454_p4 }
   0xd   :  { %p1457_p7 = pnand %p1456_p6, %p1450_p3 }
   0xf   :  { %1460 = shalt.err (!%p1457_p7)
}
  0x10   :  { %s1488_s25 = smov 128   ;;  %s1489_s26 = smov 8  }
  0x11   :  { %24 = dma.hbm_to_vmem [thread:$0]  %s1913_s1, 1152, %s19_s16, [#allocation3], %s1488_s25, %s1488_s25, %s1489_s26  }
  0x12   :  { %1483 = dma.done.wait [#allocation3], 1152  }
  0x13   :  { %1484 = vsyncadd [#allocation3], 4294966144  ;;  %v1543_v0 = vld [vmem:[%s1912_s0 + $0x10] sm:$0xff]  ;;  %v1567_v6 = vld [vmem:[%s1912_s0] sm:$0xff]  ;;  %vm280_vm0 = vcmask 1040384   ;;  %s1492_s8 = smov 16  }
  0x14   :  { %v1548_v1 = vld [vmem:[%s1912_s0 + $0x30] sm:$0xff]  ;;  %v1572_v7 = vld [vmem:[%s1912_s0 + $0x20] sm:$0xff]  ;;  %v1591_v12 = vld [vmem:[%s1912_s0 + $0x18] sm:$0xff]  ;;  %s1493_s9 = smov 15   ;;  %s1494_s10 = smov 1   ;;  %vm91_vm1 = vcmask 261120  }
  0x15   :  { %v1553_v2 = vld [vmem:[%s1912_s0 + $0x50] sm:$0xff]  ;;  %v206_v4 = vadd.f32 %v1548_v1, %v1543_v0  ;;  %v210_v5 = vmax.f32 %v1543_v0, %v1548_v1  ;;  %v1577_v8 = vld [vmem:[%s1912_s0 + $0x40] sm:$0xff]  ;;  %v204_v10 = vadd.f32 %v1572_v7, %v1567_v6  ;;  %v208_v11 = vmax.f32 %v1567_v6, %v1572_v7  ;;  %v1598_v15 = vld [vmem:[%s1912_s0 + $0x38] sm:$0xff]  ;;  %s1495_s1 = smov 127   ;;  %s1496_s11 = smov 113  }
  0x16   :  { %v1558_v3 = vld [vmem:[%s1912_s0 + $0x70] sm:$0xff]  ;;  %v1582_v9 = vld [vmem:[%s1912_s0 + $0x60] sm:$0xff]  ;;  %v1603_v16 = vld [vmem:[%s1912_s0 + $0x58] sm:$0xff]  ;;  %v207_v20 = vadd.f32 %v1598_v15, %v1591_v12  ;;  %v211_v21 = vmax.f32 %v1591_v12, %v1598_v15  ;;  %s1497_s12 = smov 112   ;;  %s1498_s13 = smov 111   ;;  %vm645_vm10 = vcmask 1041408  }
  0x17   :  { %v214_v13 = vadd.f32 %v206_v4, %v1553_v2  ;;  %v218_v14 = vmax.f32 %v210_v5, %v1553_v2  ;;  %v1608_v17 = vld [vmem:[%s1912_s0 + $0x78] sm:$0xff]  ;;  %v212_v18 = vadd.f32 %v204_v10, %v1577_v8  ;;  %v216_v19 = vmax.f32 %v208_v11, %v1577_v8  ;;  %v1619_v22 = vld [vmem:[%s1912_s0 + $0x8] sm:$0xff] }
  0x18   :  { %v1624_v23 = vld [vmem:[%s1912_s0 + $0x28] sm:$0xff]  ;;  %v215_v32 = vadd.f32 %v207_v20, %v1603_v16  ;;  %v219_v33 = vmax.f32 %v211_v21, %v1603_v16 }
  0x19   :  { %v1629_v24 = vld [vmem:[%s1912_s0 + $0x48] sm:$0xff]  ;;  %v222_v25 = vadd.f32 %v214_v13, %v1558_v3  ;;  %v226_v26 = vmax.f32 %v218_v14, %v1558_v3  ;;  %v205_v28 = vadd.f32 %v1624_v23, %v1619_v22  ;;  %v209_v29 = vmax.f32 %v1619_v22, %v1624_v23 }
  0x1a   :  { %v1636_v27 = vld [vmem:[%s1912_s0 + $0x68] sm:$0xff]  ;;  %v220_v30 = vadd.f32 %v212_v18, %v1582_v9  ;;  %v224_v31 = vmax.f32 %v216_v19, %v1582_v9  ;;  %v223_v40 = vadd.f32 %v215_v32, %v1608_v17  ;;  %v227_v41 = vmax.f32 %v219_v33, %v1608_v17  ;;  %s1491_s0 = smov 17  }
  0x1b   :  { %v240_v34 = vrot.slane %v222_v25, 4  ;;  %v268_v35 = vrot.slane %v226_v26, 4  ;;  %v213_v36 = vadd.f32 %v205_v28, %v1629_v24  ;;  %v217_v37 = vmax.f32 %v209_v29, %v1629_v24 }
  0x1c   :  { %v228_v38 = vrot.slane %v220_v30, 4  ;;  %v256_v39 = vrot.slane %v224_v31, 4  ;;  %v246_v48 = vrot.slane %v223_v40, 4  ;;  %v274_v49 = vrot.slane %v227_v41, 4 }
  0x1d   :  { %v241_v42 = vadd.f32 %v240_v34, %v222_v25  ;;  %v269_v43 = vmax.f32 %v226_v26, %v268_v35  ;;  %v221_v44 = vadd.f32 %v213_v36, %v1636_v27  ;;  %v225_v45 = vmax.f32 %v217_v37, %v1636_v27 }
  0x1e   :  { %v229_v46 = vadd.f32 %v228_v38, %v220_v30  ;;  %v257_v47 = vmax.f32 %v224_v31, %v256_v39  ;;  %v247_v56 = vadd.f32 %v246_v48, %v223_v40  ;;  %v275_v57 = vmax.f32 %v227_v41, %v274_v49 }
  0x1f   :  { %v242_v50 = vrot.slane %v241_v42, 2  ;;  %v270_v51 = vrot.slane %v269_v43, 2  ;;  %v234_v52 = vrot.slane %v221_v44, 4  ;;  %v262_v53 = vrot.slane %v225_v45, 4 }
  0x20   :  { %v230_v54 = vrot.slane %v229_v46, 2  ;;  %v258_v55 = vrot.slane %v257_v47, 2  ;;  %v248_v4 = vrot.slane %v247_v56, 2  ;;  %v276_v5 = vrot.slane %v275_v57, 2 }
  0x21   :  { %v243_v58 = vadd.f32 %v242_v50, %v241_v42  ;;  %v271_v59 = vmax.f32 %v269_v43, %v270_v51  ;;  %v235_v60 = vadd.f32 %v234_v52, %v221_v44  ;;  %v263_v61 = vmax.f32 %v225_v45, %v262_v53 }
  0x22   :  { %v231_v62 = vadd.f32 %v230_v54, %v229_v46  ;;  %v259_v63 = vmax.f32 %v257_v47, %v258_v55  ;;  %v249_v20 = vadd.f32 %v248_v4, %v247_v56  ;;  %v277_v21 = vmax.f32 %v275_v57, %v276_v5 }
  0x23   :  { %v244_v10 = vrot.slane %v243_v58, 1  ;;  %v272_v11 = vrot.slane %v271_v59, 1  ;;  %v236_v13 = vrot.slane %v235_v60, 2  ;;  %v264_v14 = vrot.slane %v263_v61, 2 }
  0x24   :  { %v232_v18 = vrot.slane %v231_v62, 1  ;;  %v260_v19 = vrot.slane %v259_v63, 1  ;;  %v250_v32 = vrot.slane %v249_v20, 1  ;;  %v278_v33 = vrot.slane %v277_v21, 1 }
  0x25   :  { %v245_v25 = vadd.f32 %v244_v10, %v243_v58  ;;  %v273_v26 = vmax.f32 %v271_v59, %v272_v11  ;;  %v237_v28 = vadd.f32 %v236_v13, %v235_v60  ;;  %v265_v29 = vmax.f32 %v263_v61, %v264_v14  ;;  %v1687_v13 = vld [vmem:[%s1914_s2 + $0x20] sm:$0xff]   ;;  %v1701_v14 = vld [vmem:[%s1914_s2 + $0x28] sm:$0xff]  }
  0x26   :  { %v233_v30 = vadd.f32 %v232_v18, %v231_v62  ;;  %v261_v31 = vmax.f32 %v259_v63, %v260_v19  ;;  %v251_v38 = vadd.f32 %v250_v32, %v249_v20  ;;  %v279_v39 = vmax.f32 %v277_v21, %v278_v33  ;;  %v72_v32 = vld [vmem:[%s1915_s3 + $0x18] sm:$0xff] }
  0x27   :  { %v254_v34 = vmul.f32 0.03125, %v245_v25  ;;  %v238_v35 = vrot.slane %v237_v28, 1  ;;  %v266_v36 = vrot.slane %v265_v29, 1  ;;  %v1490_v40 = vmov 1983009808  }
  0x28   :  { %v252_v37 = vmul.f32 0.03125, %v233_v30  ;;  %v294_v41 = vunpack.c.l.s4 %v1490_v40  ;;  %v296_v45 = vlaneseq  ;;  %v255_v47 = vmul.f32 0.03125, %v251_v38  ;;  %v76_v40 = vld [vmem:[%s1915_s3 + $0x38] sm:$0xff] }
  0x29   :  { %v283_v42 = vsel %vm280_vm0, %v254_v34, %v273_v26  ;;  %v239_v43 = vadd.f32 %v238_v35, %v237_v28  ;;  %v267_v44 = vmax.f32 %v265_v29, %v266_v36  ;;  %v50_v59 = vpack.c.bf16 %v1624_v23, %v1619_v22  ;;  %v70_v28 = vld [vmem:[%s1915_s3 + $0x8] sm:$0xff]  ;;  %v69_v29 = vld [vmem:[%s1915_s3] sm:$0xff] }
  0x2a   :  { %314 = vrot.lane.b32.xlu1 %v283_v42, %s1491_s0  ;;  %v281_v46 = vsel %vm280_vm0, %v252_v37, %v261_v31  ;;  %v295_v48 = vunpack.c.0.s8 %v294_v41  ;;  %v297_v50 = vshrl.u32 %v296_v45, 7  ;;  %v284_v51 = vsel %vm280_vm0, %v255_v47, %v279_v39  ;;  %v71_v31 = vld [vmem:[%s1915_s3 + $0x10] sm:$0xff]  ;;  %v73_v35 = vld [vmem:[%s1915_s3 + $0x20] sm:$0xff]  ;;  %v74_v36 = vld [vmem:[%s1915_s3 + $0x28] sm:$0xff] }
  0x2b   :  { %310 = vrot.lane.b32.xlu0 %v281_v46, %s1491_s0  ;;  %v253_v49 = vmul.f32 0.03125, %v239_v43  ;;  %v292_v54 = vcombine.low %v283_v42, %v284_v51  ;;  %v49_v60 = vpack.c.bf16 %v1572_v7, %v1567_v6  ;;  %98 = vmatprep.subr.bf16.mxu0 %v50_v59  ;;  %v52_v61 = vpack.c.bf16 %v1598_v15, %v1591_v12  ;;  %v75_v39 = vld [vmem:[%s1915_s3 + $0x30] sm:$0xff]  ;;  %v77_v43 = vld [vmem:[%s1915_s3 + $0x40] sm:$0xff] }
  0x2c   :  { %v1657_v53 = vsub.s32 %v295_v48, %v297_v50  ;;  %v51_v62 = vpack.c.bf16 %v1548_v1, %v1543_v0  ;;  %v54_v63 = vpack.c.bf16 %v1636_v27, %v1629_v24  ;;  %v53_v4 = vpack.c.bf16 %v1582_v9, %v1577_v8  ;;  %v80_v50 = vld [vmem:[%s1915_s3 + $0x58] sm:$0xff] }
  0x2d   :  { %v282_v52 = vsel %vm280_vm0, %v253_v49, %v267_v44  ;;  %99 = vmatpush1.bf16.msra.mxu0 %v49_v60  ;;  %151 = vmatprep.subr.bf16.mxu1 %v52_v61  ;;  %v56_v5 = vpack.c.bf16 %v1608_v17, %v1603_v16  ;;  %v1499_v10 = vmov 0   ;;  %v55_v11 = vpack.c.bf16 %v1558_v3, %v1553_v2  ;;  %v78_v44 = vld [vmem:[%s1915_s3 + $0x48] sm:$0xff]  ;;  %v79_v49 = vld [vmem:[%s1915_s3 + $0x50] sm:$0xff] }
  0x2e   :  { %316 = vrot.lane.b32.xlu1 %v284_v51, %s1491_s0  ;;  %v291_v55 = vcombine.low %v281_v46, %v282_v52  ;;  %v1660_v56 = vrot.slane %v292_v54, %v1657_v53  ;;  %152 = vmatpush1.bf16.msra.mxu1 %v51_v62  ;;  %v1740_v47 = vand.u32 127, %v296_v45 }
  0x2f   :  { %312 = vrot.lane.b32.xlu0 %v282_v52, %s1491_s0  ;;  %130 = vmatprep.mubr.bf16.mxu0 %v1499_v10 }
  0x30   :  { %v1663_v57 = vrot.slane %v291_v55, %v1657_v53  ;;  %100 = vmatprep.subr.bf16.mxu0 %v54_v63  ;;  %153 = vmatprep.subr.bf16.mxu1 %v56_v5  ;;  %vm320_vm2 = vcmp.lt.s32.totalorder %v1740_v47, 17  ;;  %vm358_vm3 = vcmp.lt.s32.totalorder %v1740_v47, 16  ;;  %vm397_vm4 = vcmp.lt.s32.totalorder %v1740_v47, 15 }
  0x31   :  { %101 = vmatpush1.bf16.msra.mxu0 %v53_v4  ;;  %183 = vmatprep.mubr.bf16.mxu1 %v1499_v10  ;;  %vm436_vm5 = vcmp.lt.s32.totalorder %v1740_v47, 1  ;;  %vm475_vm6 = vcmp.lt.s32.totalorder %v1740_v47, 127  ;;  %vm514_vm7 = vcmp.lt.s32.totalorder %v1740_v47, 113  ;;  %vm553_vm8 = vcmp.lt.s32.totalorder %v1740_v47, 112 }
  0x32   :  { %352 = vrot.lane.b32.xlu1 %v282_v52, %s1492_s8  ;;  %v307_v58 = vcombine.low %v1663_v57, %v1660_v56  ;;  %1415 = vset.pattern.permute.xlu0 %v1499_v10  ;;  %vm592_vm9 = vcmp.lt.s32.totalorder %v1740_v47, 111 }
  0x33   :  { %350 = vrot.lane.b32.xlu0 %v281_v46, %s1492_s8  ;;  %1416 = vset.pattern.permute.xlu1 %v1499_v10 }
  0x34   :  { %154 = vmatpush1.bf16.msra.mxu1 %v55_v11  ;;  %1323 = vmatmul.mubr.msk.bf16.vlgmr.msra.gmra.mrb[0].mxu0 %vm91_vm1, %v1687_v13 }
  0x35   :  { %140 = vmatprep.mubr.bf16.mxu0 %v1499_v10 }
  0x36   :  { %356 = vrot.lane.b32.xlu1 %v284_v51, %s1492_s8 }
  0x37   :  { %354 = vrot.lane.b32.xlu0 %v283_v42, %s1492_s8  ;;  %1325 = vmatmul.mubr.msk.bf16.vlgmr.msra.gmra.mrb[0].mxu1 %vm91_vm1, %v1687_v13 }
  0x38   :  { %193 = vmatprep.mubr.bf16.mxu1 %v1499_v10 }
  0x3a   :  { %391 = vrot.lane.b32.xlu1 %v282_v52, %s1493_s9 }
  0x3b   :  { %389 = vrot.lane.b32.xlu0 %v281_v46, %s1493_s9 }
  0x3c   :  { %1324 = vmatmul.mubr.msk.bf16.gmra.mrb[4].mxu0 %vm91_vm1, %v1701_v14 }
  0x3d   :  { %826 = vmatprep.mubr.bf16.mxu0 %v1499_v10 }
  0x3e   :  { %395 = vrot.lane.b32.xlu1 %v284_v51, %s1493_s9 }
  0x3f   :  { %393 = vrot.lane.b32.xlu0 %v283_v42, %s1493_s9  ;;  %1326 = vmatmul.mubr.msk.bf16.gmra.mrb[4].mxu1 %vm91_vm1, %v1701_v14 }
  0x40   :  { %899 = vmatprep.mubr.bf16.mxu1 %v1499_v10 }
  0x42   :  { %430 = vrot.lane.b32.xlu1 %v282_v52, %s1494_s10 }
  0x43   :  { %428 = vrot.lane.b32.xlu0 %v281_v46, %s1494_s10 }
  0x46   :  { %434 = vrot.lane.b32.xlu1 %v284_v51, %s1494_s10 }
  0x47   :  { %432 = vrot.lane.b32.xlu0 %v283_v42, %s1494_s10 }
  0x4a   :  { %469 = vrot.lane.b32.xlu1 %v282_v52, %s1495_s1 }
  0x4b   :  { %467 = vrot.lane.b32.xlu0 %v281_v46, %s1495_s1 }
  0x4e   :  { %473 = vrot.lane.b32.xlu1 %v284_v51, %s1495_s1 }
  0x4f   :  { %471 = vrot.lane.b32.xlu0 %v283_v42, %s1495_s1 }
  0x52   :  { %508 = vrot.lane.b32.xlu1 %v282_v52, %s1496_s11 }
  0x53   :  { %506 = vrot.lane.b32.xlu0 %v281_v46, %s1496_s11 }
  0x56   :  { %512 = vrot.lane.b32.xlu1 %v284_v51, %s1496_s11 }
  0x57   :  { %510 = vrot.lane.b32.xlu0 %v283_v42, %s1496_s11 }
  0x5a   :  { %547 = vrot.lane.b32.xlu1 %v282_v52, %s1497_s12 }
  0x5b   :  { %545 = vrot.lane.b32.xlu0 %v281_v46, %s1497_s12 }
  0x5e   :  { %551 = vrot.lane.b32.xlu1 %v284_v51, %s1497_s12 }
  0x5f   :  { %549 = vrot.lane.b32.xlu0 %v283_v42, %s1497_s12 }
  0x62   :  { %586 = vrot.lane.b32.xlu1 %v282_v52, %s1498_s13 }
  0x63   :  { %584 = vrot.lane.b32.xlu0 %v281_v46, %s1498_s13 }
  0x66   :  { %590 = vrot.lane.b32.xlu1 %v284_v51, %s1498_s13 }
  0x67   :  { %588 = vrot.lane.b32.xlu0 %v283_v42, %s1498_s13 }
  0x6a   :  { %729 = vperm.xlu1 %1416, %v70_v28  }
  0x6b   :  { %724 = vperm.xlu0 %1415, %v69_v29  }
  0x6e   :  { %734 = vperm.xlu1 %1416, %v71_v31  }
  0x6f   :  { %739 = vperm.xlu0 %1415, %v72_v32  }
  0x72   :  { %744 = vperm.xlu1 %1416, %v73_v35  }
  0x73   :  { %749 = vperm.xlu0 %1415, %v74_v36  }
  0x76   :  { %754 = vperm.xlu1 %1416, %v75_v39  }
  0x77   :  { %759 = vperm.xlu0 %1415, %v76_v40  }
  0x7a   :  { %1254 = vperm.xlu1 %1416, %v77_v43  }
  0x7b   :  { %1259 = vperm.xlu0 %1415, %v78_v44  }
  0x7e   :  { %1264 = vperm.xlu1 %1416, %v79_v49  }
  0x7f   :  { %1269 = vperm.xlu0 %1415, %v80_v50  }
  0x9c   :  { %v315_v18 = vpop.permute.xlu1 %314 }
  0x9d   :  { %v311_v19 = vpop.permute.xlu0 %310 }
  0xa0   :  { %v317_v20 = vpop.permute.xlu1 %316 }
  0xa1   :  { %v313_v21 = vpop.permute.xlu0 %312  ;;  %v321_v45 = vsel %vm320_vm2, %v315_v18, %v317_v20  ;;  %v324_v55 = vsel %vm320_vm2, %v317_v20, %v311_v19 }
  0xa2   :  { %v322_v59 = vsel %vm320_vm2, %v313_v21, %v315_v18  ;;  %v323_v60 = vsel %vm320_vm2, %v311_v19, %v313_v21 }
  0xa3   :  { %v330_v5 = vcombine.low %v324_v55, %v323_v60  ;;  %v331_v11 = vcombine.low %v322_v59, %v321_v45 }
  0xa4   :  { %v353_v25 = vpop.permute.xlu1 %352 }
  0xa5   :  { %v351_v26 = vpop.permute.xlu0 %350  ;;  %v338_v36 = vrot.slane %v330_v5, %v1657_v53  ;;  %v345_v39 = vrot.slane %v331_v11, %v1657_v53  ;;  %v364_v11 = vld [vmem:[#allocation2 + $0x8] sm:$0xff] }
  0xa6   :  { %v361_v29 = vsel %vm358_vm3, %v351_v26, %v353_v25 }
  0xa8   :  { %v357_v30 = vpop.permute.xlu1 %356 }
  0xa9   :  { %v355_v33 = vpop.permute.xlu0 %354  ;;  %v362_v61 = vsel %vm358_vm3, %v357_v30, %v351_v26 }
  0xaa   :  { %v359_v62 = vsel %vm358_vm3, %v355_v33, %v357_v30  ;;  %v360_v63 = vsel %vm358_vm3, %v353_v25, %v355_v33  ;;  %v369_v31 = vcombine.low %v362_v61, %v361_v29 }
  0xab   :  { %v370_v32 = vcombine.low %v360_v63, %v359_v62  ;;  %v346_v62 = vcombine.low %v338_v36, %v345_v39 }
  0xac   :  { %v392_v34 = vpop.permute.xlu1 %391  ;;  %v377_v33 = vrot.slane %v369_v31, %v1657_v53 }
  0xad   :  { %v390_v37 = vpop.permute.xlu0 %389  ;;  %v384_v25 = vrot.slane %v370_v32, %v1657_v53 }
  0xae   :  { %v400_v43 = vsel %vm397_vm4, %v390_v37, %v392_v34 }
  0xaf   :  { %v385_v63 = vcombine.low %v377_v33, %v384_v25 }
  0xb0   :  { %v396_v38 = vpop.permute.xlu1 %395 }
  0xb1   :  { %v394_v41 = vpop.permute.xlu0 %393  ;;  %v401_v19 = vsel %vm397_vm4, %v396_v38, %v390_v37 }
  0xb2   :  { %v398_v20 = vsel %vm397_vm4, %v394_v41, %v396_v38  ;;  %v399_v21 = vsel %vm397_vm4, %v392_v34, %v394_v41  ;;  %v408_v50 = vcombine.low %v401_v19, %v400_v43 }
  0xb3   :  { %v409_v45 = vcombine.low %v399_v21, %v398_v20 }
  0xb4   :  { %v431_v42 = vpop.permute.xlu1 %430 }
  0xb5   :  { %v429_v46 = vpop.permute.xlu0 %428 }
  0xb6   :  { %v439_v44 = vsel %vm436_vm5, %v429_v46, %v431_v42 }
  0xb8   :  { %v435_v48 = vpop.permute.xlu1 %434 }
  0xb9   :  { %v433_v51 = vpop.permute.xlu0 %432  ;;  %v440_v30 = vsel %vm436_vm5, %v435_v48, %v429_v46 }
  0xba   :  { %v437_v26 = vsel %vm436_vm5, %v433_v51, %v435_v48  ;;  %v438_v40 = vsel %vm436_vm5, %v431_v42, %v433_v51  ;;  %v447_v55 = vcombine.low %v440_v30, %v439_v44  ;;  %v286_v48 = vld [vmem:[#allocation2 + $0x20] sm:$0xff]  ;;  %v387_v30 = vmul.f32 %v385_v63, %v364_v11 }
  0xbb   :  { %v448_v60 = vcombine.low %v438_v40, %v437_v26  ;;  %v325_v51 = vld [vmem:[#allocation2] sm:$0xff]  ;;  %v309_v20 = vmul.f32 %v307_v58, %v286_v48  ;;  %v520_v48 = vld [vmem:[#allocation2 + $0x30] sm:$0xff] }
  0xbc   :  { %v470_v52 = vpop.permute.xlu1 %469  ;;  %v348_v21 = vmul.f32 %v346_v62, %v325_v51 }
  0xbd   :  { %v468_v54 = vpop.permute.xlu0 %467  ;;  %v462_v32 = vrot.slane %v448_v60, %v1657_v53  ;;  %v442_v60 = vld [vmem:[#allocation2 + $0x18] sm:$0xff] }
  0xbe   :  { %v478_v5 = vsel %vm475_vm6, %v468_v54, %v470_v52 }
  0xc0   :  { %v474_v4 = vpop.permute.xlu1 %473 }
  0xc1   :  { %v472_v28 = vpop.permute.xlu0 %471  ;;  %v479_v61 = vsel %vm475_vm6, %v474_v4, %v468_v54  ;;  %v455_v54 = vrot.slane %v447_v55, %v1657_v53 }
  0xc2   :  { %v476_v38 = vsel %vm475_vm6, %v472_v28, %v474_v4  ;;  %v477_v41 = vsel %vm475_vm6, %v470_v52, %v472_v28  ;;  %v416_v4 = vrot.slane %v408_v50, %v1657_v53  ;;  %v423_v28 = vrot.slane %v409_v45, %v1657_v53 }
  0xc3   :  { %v486_v29 = vcombine.low %v478_v5, %v477_v41  ;;  %v487_v31 = vcombine.low %v476_v38, %v479_v61 }
  0xc4   :  { %v509_v35 = vpop.permute.xlu1 %508  ;;  %v424_v25 = vcombine.low %v416_v4, %v423_v28 }
  0xc5   :  { %v507_v18 = vpop.permute.xlu0 %506  ;;  %v494_v26 = vrot.slane %v486_v29, %v1657_v53  ;;  %v501_v40 = vrot.slane %v487_v31, %v1657_v53 }
  0xc6   :  { %v517_v36 = vsel %vm514_vm7, %v507_v18, %v509_v35 }
  0xc7   :  { %v502_v41 = vcombine.low %v494_v26, %v501_v40  ;;  %v598_v26 = vld [vmem:[#allocation2 + $0x40] sm:$0xff] }
  0xc8   :  { %v513_v49 = vpop.permute.xlu1 %512 }
  0xc9   :  { %v511_v59 = vpop.permute.xlu0 %510  ;;  %v518_v34 = vsel %vm514_vm7, %v513_v49, %v507_v18 }
  0xca   :  { %v515_v37 = vsel %vm514_vm7, %v511_v59, %v513_v49  ;;  %v516_v42 = vsel %vm514_vm7, %v509_v35, %v511_v59  ;;  %v403_v49 = vld [vmem:[#allocation2 + $0x10] sm:$0xff]  ;;  %v463_v35 = vcombine.low %v455_v54, %v462_v32  ;;  %v349_v59 = vadd.f32 %v348_v21, %v309_v20 }
  0xcb   :  { %v525_v39 = vcombine.low %v517_v36, %v516_v42  ;;  %v526_v19 = vcombine.low %v515_v37, %v518_v34  ;;  %v426_v38 = vmul.f32 %v424_v25, %v403_v49  ;;  %v481_v34 = vld [vmem:[#allocation2 + $0x28] sm:$0xff] }
  0xcc   :  { %v548_v46 = vpop.permute.xlu1 %547  ;;  %v388_v37 = vadd.f32 %v387_v30, %v349_v59  ;;  %v465_v42 = vmul.f32 %v463_v35, %v442_v60  ;;  %v504_v4 = vmul.f32 %v502_v41, %v481_v34 }
  0xcd   :  { %v546_v52 = vpop.permute.xlu0 %545  ;;  %v533_v55 = vrot.slane %v525_v39, %v1657_v53  ;;  %v540_v56 = vrot.slane %v526_v19, %v1657_v53 }
  0xce   :  { %v556_v18 = vsel %vm553_vm8, %v546_v52, %v548_v46  ;;  %v427_v11 = vadd.f32 %v426_v38, %v388_v37 }
  0xd0   :  { %v552_v33 = vpop.permute.xlu1 %551  ;;  %v466_v39 = vadd.f32 %v465_v42, %v427_v11 }
  0xd1   :  { %v557_v43 = vsel %vm553_vm8, %v552_v33, %v546_v52  ;;  %v550_v44 = vpop.permute.xlu0 %549  ;;  %v559_v52 = vld [vmem:[#allocation2 + $0x38] sm:$0xff] }
  0xd2   :  { %v554_v50 = vsel %vm553_vm8, %v550_v44, %v552_v33  ;;  %v555_v45 = vsel %vm553_vm8, %v548_v46, %v550_v44  ;;  %v541_v46 = vcombine.low %v533_v55, %v540_v56  ;;  %v505_v30 = vadd.f32 %v504_v4, %v466_v39 }
  0xd3   :  { %v564_v57 = vcombine.low %v556_v18, %v555_v45  ;;  %v565_v58 = vcombine.low %v554_v50, %v557_v43 }
  0xd4   :  { %v587_v61 = vpop.permute.xlu1 %586  ;;  %v543_v19 = vmul.f32 %v541_v46, %v520_v48 }
  0xd5   :  { %v572_v62 = vrot.slane %v564_v57, %v1657_v53  ;;  %v579_v63 = vrot.slane %v565_v58, %v1657_v53  ;;  %v585_v5 = vpop.permute.xlu0 %584 }
  0xd6   :  { %v595_v54 = vsel %vm592_vm9, %v585_v5, %v587_v61  ;;  %v544_v40 = vadd.f32 %v543_v19, %v505_v30 }
  0xd7   :  { %v580_v28 = vcombine.low %v572_v62, %v579_v63 }
  0xd8   :  { %v591_v51 = vpop.permute.xlu1 %590 }
  0xd9   :  { %v596_v29 = vsel %vm592_vm9, %v591_v51, %v585_v5  ;;  %v589_v31 = vpop.permute.xlu0 %588  ;;  %v582_v33 = vmul.f32 %v580_v28, %v559_v52 }
  0xda   :  { %v593_v32 = vsel %vm592_vm9, %v589_v31, %v591_v51  ;;  %v594_v36 = vsel %vm592_vm9, %v587_v61, %v589_v31 }
  0xdb   :  { %v603_v20 = vcombine.low %v595_v54, %v594_v36  ;;  %v604_v21 = vcombine.low %v593_v32, %v596_v29  ;;  %v583_v44 = vadd.f32 %v582_v33, %v544_v40 }
  0xdd   :  { %v611_v25 = vrot.slane %v603_v20, %v1657_v53  ;;  %v618_v47 = vrot.slane %v604_v21, %v1657_v53 }
  0xdf   :  { %v619_v43 = vcombine.low %v611_v25, %v618_v47 }
  0xe1   :  { %v621_v49 = vmul.f32 %v619_v43, %v598_v26 }
  0xe3   :  { %v622_v35 = vadd.f32 %v621_v49, %v583_v44 }
  0xe5   :  { %v624_v18 = vcombine.high %v622_v35, %v622_v35  ;;  %v631_v50 = vrot.slane %v622_v35, %v1657_v53 }
  0xe7   :  { %v638_v45 = vrot.slane %v624_v18, %v1657_v53  ;;  %v639_v55 = vcombine.high %v631_v50, %v631_v50  ;;  %v646_v56 = vsel %vm645_vm10, %v631_v50, 0.0 }
  0xe8   :  { %v647_v57 = vrot.slane %v646_v56, 4 }
  0xe9   :  { %v640_v58 = vcombine.high %v638_v45, %v638_v45  ;;  %v653_v59 = vsel %vm645_vm10, %v639_v55, 0.0  ;;  %v660_v60 = vsel %vm645_vm10, %v638_v45, 0.0 }
  0xea   :  { %v648_v61 = vadd.f32 %v647_v57, %v646_v56  ;;  %v654_v38 = vrot.slane %v653_v59, 4  ;;  %v661_v41 = vrot.slane %v660_v60, 4 }
  0xeb   :  { %v667_v62 = vsel %vm645_vm10, %v640_v58, 0.0 }
  0xec   :  { %v649_v63 = vrot.slane %v648_v61, 2  ;;  %v655_v5 = vadd.f32 %v654_v38, %v653_v59  ;;  %v662_v34 = vadd.f32 %v661_v41, %v660_v60  ;;  %v668_v37 = vrot.slane %v667_v62, 4 }
  0xee   :  { %v650_v42 = vadd.f32 %v649_v63, %v648_v61  ;;  %v656_v46 = vrot.slane %v655_v5, 2  ;;  %v663_v48 = vrot.slane %v662_v34, 2  ;;  %v669_v51 = vadd.f32 %v668_v37, %v667_v62  ;;  %v725_v37 = vpop.permute.xlu0 %724 }
  0xf0   :  { %v651_v11 = vrot.slane %v650_v42, 1  ;;  %v657_v53 = vadd.f32 %v656_v46, %v655_v5  ;;  %v664_v4 = vadd.f32 %v663_v48, %v662_v34  ;;  %v670_v28 = vrot.slane %v669_v51, 2  ;;  %v1841_v34 = vld [vmem:[%s1914_s2 + $0x18] sm:$0xff]   ;;  %v730_v46 = vpop.permute.xlu1 %729 }
  0xf2   :  { %v652_v29 = vadd.f32 %v651_v11, %v650_v42  ;;  %v658_v31 = vrot.slane %v657_v53, 1  ;;  %v665_v52 = vrot.slane %v664_v4, 1  ;;  %v671_v54 = vadd.f32 %v670_v28, %v669_v51 }
  0xf4   :  { %v659_v32 = vadd.f32 %v658_v31, %v657_v53  ;;  %v666_v36 = vadd.f32 %v665_v52, %v664_v4  ;;  %v672_v39 = vrot.slane %v671_v54, 1  ;;  %v1327_v19 = vmul.f32 -1.442695, %v652_v29 }
  0xf6   :  { %v673_v20 = vadd.f32 %v672_v39, %v671_v54  ;;  %1423 = vpow2.f32 %v1327_v19  ;;  %v1328_v21 = vmul.f32 -1.442695, %v659_v32  ;;  %v1329_v30 = vmul.f32 -1.442695, %v666_v36 }
  0xf8   :  { %1425 = vpow2.f32 %v1328_v21  ;;  %v1330_v33 = vmul.f32 -1.442695, %v673_v20 }
  0xf9   :  { %1427 = vpow2.f32 %v1329_v30 }
  0xfa   :  { %1429 = vpow2.f32 %v1330_v33 }
 0x100   :  { %v1424_v25 = vpop.eup %1423 }
 0x101   :  { %v686_v47 = vadd.f32 1.0, %v1424_v25 }
 0x102   :  { %v1426_v26 = vpop.eup %1425 }
 0x103   :  { %v1428_v40 = vpop.eup %1427  ;;  %v687_v43 = vadd.f32 1.0, %v1426_v26  ;;  %1431 = vrcp.f32 %v686_v47 }
 0x104   :  { %v1430_v44 = vpop.eup %1429  ;;  %v688_v49 = vadd.f32 1.0, %v1428_v40 }
 0x105   :  { %v689_v35 = vadd.f32 1.0, %v1430_v44  ;;  %1433 = vrcp.f32 %v687_v43 }
 0x106   :  { %1435 = vrcp.f32 %v688_v49 }
 0x107   :  { %1437 = vrcp.f32 %v689_v35 }
 0x10d   :  { %v1432_v18 = vpop.eup %1431 }
 0x10e   :  { %v698_v45 = vmul.f32 %v1432_v18, %v1567_v6  ;;  %v702_v55 = vmul.f32 %v1432_v18, %v1572_v7  ;;  %v706_v62 = vmul.f32 %v1432_v18, %v1577_v8  ;;  %v1419_v8 = vld [vmem:[%s1914_s2] sm:$0xff]   ;;  %v1849_v11 = vsub.f32 1.0, %v1432_v18 }
 0x10f   :  { %v1434_v50 = vpop.eup %1433 }
 0x110   :  { %v1787_v56 = vpop.eup %1435  ;;  %v699_v57 = vmul.f32 %v1434_v50, %v1619_v22  ;;  %v703_v58 = vmul.f32 %v1434_v50, %v1624_v23  ;;  %v707_v59 = vmul.f32 %v1434_v50, %v1629_v24  ;;  %v711_v61 = vmul.f32 %v1434_v50, %v1636_v27 }
 0x111   :  { %v1792_v60 = vpop.eup %1437  ;;  %v700_v38 = vmul.f32 %v1787_v56, %v1543_v0  ;;  %v704_v6 = vmul.f32 %v1787_v56, %v1548_v1  ;;  %v714_v24 = vpack.c.bf16 %v702_v55, %v698_v45  ;;  %v710_v0 = vmul.f32 %v1432_v18, %v1582_v9 }
 0x112   :  { %v715_v41 = vpack.c.bf16 %v703_v58, %v699_v57  ;;  %v701_v7 = vmul.f32 %v1792_v60, %v1591_v12  ;;  %v705_v22 = vmul.f32 %v1792_v60, %v1598_v15  ;;  %v709_v23 = vmul.f32 %v1792_v60, %v1603_v16  ;;  %v735_v57 = vpop.permute.xlu1 %734 }
 0x113   :  { %v713_v27 = vmul.f32 %v1792_v60, %v1608_v17  ;;  %v719_v1 = vpack.c.bf16 %v711_v61, %v707_v59  ;;  %v716_v5 = vpack.c.bf16 %v704_v6, %v700_v38  ;;  %v708_v12 = vmul.f32 %v1787_v56, %v1553_v2  ;;  %v1420_v2 = vld [vmem:[%s1914_s2 + $0x8] sm:$0xff]   ;;  %v740_v6 = vpop.permute.xlu0 %739 }
 0x114   :  { %794 = vmatprep.subr.bf16.mxu0 %v715_v41  ;;  %v717_v63 = vpack.c.bf16 %v705_v22, %v701_v7  ;;  %v712_v15 = vmul.f32 %v1787_v56, %v1558_v3  ;;  %v718_v17 = vpack.c.bf16 %v710_v0, %v706_v62  ;;  %v1830_v3 = vld [vmem:[%s1914_s2 + $0x10] sm:$0xff]   ;;  %v1851_v4 = vsub.f32 1.0, %v1434_v50  ;;  %s1500_s2 = smov [#allocation5]  }
 0x115   :  { %795 = vmatpush1.bf16.msra.mxu0 %v714_v24  ;;  %v721_v16 = vpack.c.bf16 %v713_v27, %v709_v23  ;;  %v1854_v32 = vsub.f32 1.0, %v1787_v56  ;;  %v1857_v30 = vsub.f32 1.0, %v1792_v60  ;;  %s1309_s21 = sshll.u32 %s1500_s2, 4  ;;  %s1310_s21 = int_to_ptr.vmem [resolvable:$true] %s1309_s21 }
 0x116   :  { %796 = vmatprep.subr.bf16.mxu0 %v719_v1  ;;  %867 = vmatprep.subr.bf16.mxu1 %v717_v63  ;;  %v720_v9 = vpack.c.bf16 %v712_v15, %v708_v12  ;;  %s1461_s22 = scalar_lea.vmem %s1310_s21, 2048  ;;  %p1466_p9 = scmp.lt.s32.totalorder %s1310_s21, %s1310_s21 }
 0x117   :  { %868 = vmatpush1.bf16.msra.mxu1 %v716_v5  ;;  %p1462_p8 = scmp.ne.s32.totalorder %s1310_s21, %s1461_s22  ;;  %p1467_p10 = scmp.lt.s32.totalorder %s1461_s22, %s1461_s22 }
 0x118   :  { %869 = vmatprep.subr.bf16.mxu1 %v721_v16 }
 0x119   :  { %797 = vmatpush1.bf16.msra.mxu0 %v718_v17  ;;  %p1468_p11 = por %p1467_p10, %p1466_p9 }
 0x11b   :  { %870 = vmatpush1.bf16.msra.mxu1 %v720_v9  ;;  %p1469_p12 = pnand %p1468_p11, %p1462_p8 }
 0x11c   :  { %1335 = vmatmul.mubr.msk.bf16.vlgmr.msra.gmra.mrb[8].mxu0 %vm91_vm1, %v1419_v8 }
 0x11d   :  { %836 = vmatprep.mubr.bf16.mxu0 %v1499_v10 }
 0x11e   :  { %1339 = vmatmul.mubr.msk.bf16.vlgmr.msra.gmra.mrb[8].mxu1 %vm91_vm1, %v1419_v8 }
 0x11f   :  { %909 = vmatprep.mubr.bf16.mxu1 %v1499_v10 }
 0x124   :  { %1336 = vmatmul.mubr.msk.bf16.gmra.mrb[12].mxu0 %vm91_vm1, %v1420_v2 }
 0x125   :  { %846 = vmatprep.mubr.bf16.mxu0 %v1499_v10 }
 0x126   :  { %1340 = vmatmul.mubr.msk.bf16.gmra.mrb[12].mxu1 %vm91_vm1, %v1420_v2 }
 0x127   :  { %919 = vmatprep.mubr.bf16.mxu1 %v1499_v10 }
 0x12c   :  { %1337 = vmatmul.mubr.msk.bf16.gmra.mrb[16].mxu0 %vm91_vm1, %v1830_v3 }
 0x12d   :  { %856 = vmatprep.mubr.bf16.mxu0 %v1499_v10 }
 0x12e   :  { %1341 = vmatmul.mubr.msk.bf16.gmra.mrb[16].mxu1 %vm91_vm1, %v1830_v3 }
 0x12f   :  { %929 = vmatprep.mubr.bf16.mxu1 %v1499_v10 }
 0x134   :  { %1338 = vmatmul.mubr.msk.bf16.gmra.mrb[20].mxu0 %vm91_vm1, %v1841_v34 }
 0x135   :  { %1032 = vmatprep.mubr.bf16.mxu0 %v1499_v10 }
 0x136   :  { %1342 = vmatmul.mubr.msk.bf16.gmra.mrb[20].mxu1 %vm91_vm1, %v1841_v34 }
 0x137   :  { %1085 = vmatprep.mubr.bf16.mxu1 %v1499_v10 }
 0x1ef   :  { %v828_v42 = vpop.f32.mrb[8].mxu0 }
 0x1f0   :  { %v829_v48 = vadd.f32 %v828_v42, %v725_v37  ;;  %v830_v51 = vpop.f32.mrb[9].mxu0 }
 0x1f1   :  { %v831_v53 = vadd.f32 %v830_v51, %v725_v37  ;;  %v832_v28 = vpop.f32.mrb[10].mxu0  ;;  %v901_v29 = vpop.f32.mrb[8].mxu1 }
 0x1f2   :  { %v940_v31 = vmul.f32 0.1, %v829_v48  ;;  %v833_v52 = vadd.f32 %v832_v28, %v730_v46  ;;  %v902_v54 = vadd.f32 %v901_v29, %v725_v37  ;;  %v834_v36 = vpop.f32.mrb[11].mxu0  ;;  %v903_v39 = vpop.f32.mrb[9].mxu1 }
 0x1f3   :  { %v941_v19 = vmul.f32 0.1, %v831_v53  ;;  %v835_v20 = vadd.f32 %v834_v36, %v730_v46  ;;  %v904_v21 = vadd.f32 %v903_v39, %v725_v37  ;;  %v905_v33 = vpop.f32.mrb[10].mxu1 }
 0x1f4   :  { %v956_v25 = vmax.f32 %v829_v48, %v940_v31  ;;  %v944_v47 = vmul.f32 0.1, %v833_v52  ;;  %v942_v26 = vmul.f32 0.1, %v902_v54  ;;  %v906_v40 = vadd.f32 %v905_v33, %v730_v46  ;;  %v907_v43 = vpop.f32.mrb[11].mxu1 }
 0x1f5   :  { %v957_v44 = vmax.f32 %v831_v53, %v941_v19  ;;  %v945_v49 = vmul.f32 0.1, %v835_v20  ;;  %v943_v35 = vmul.f32 0.1, %v904_v21  ;;  %v908_v18 = vadd.f32 %v907_v43, %v730_v46 }
 0x1f6   :  { %v1860_v50 = vmul.f32 %v1849_v11, %v956_v25  ;;  %v960_v45 = vmax.f32 %v833_v52, %v944_v47  ;;  %v958_v55 = vmax.f32 %v902_v54, %v942_v26  ;;  %v946_v56 = vmul.f32 0.1, %v906_v40 }
 0x1f7   :  { %v977_v58 = vmul.f32 %v1851_v4, %v957_v44  ;;  %v961_v59 = vmax.f32 %v835_v20, %v945_v49  ;;  %v959_v60 = vmax.f32 %v904_v21, %v943_v35  ;;  %v947_v61 = vmul.f32 0.1, %v908_v18  ;;  %v838_v38 = vpop.f32.mrb[12].mxu0 }
 0x1f8   :  { %v980_v41 = vmul.f32 %v1849_v11, %v960_v45  ;;  %v978_v7 = vmul.f32 %v1854_v32, %v958_v55  ;;  %v962_v22 = vmax.f32 %v906_v40, %v946_v56  ;;  %v839_v23 = vadd.f32 %v838_v38, %v735_v57  ;;  %v840_v24 = vpop.f32.mrb[13].mxu0 }
 0x1f9   :  { %v981_v27 = vmul.f32 %v1851_v4, %v961_v59  ;;  %v979_v62 = vmul.f32 %v1857_v30, %v959_v60  ;;  %v963_v0 = vmax.f32 %v908_v18, %v947_v61  ;;  %v841_v1 = vadd.f32 %v840_v24, %v735_v57  ;;  %v842_v63 = vpop.f32.mrb[14].mxu0  ;;  %v911_v5 = vpop.f32.mrb[12].mxu1 }
 0x1fa   :  { %v992_v12 = vpack.c.bf16 %v980_v41, %v1860_v50  ;;  %v982_v15 = vmul.f32 %v1854_v32, %v962_v22  ;;  %v948_v16 = vmul.f32 0.1, %v839_v23  ;;  %v843_v17 = vadd.f32 %v842_v63, %v740_v6  ;;  %v844_v8 = vpop.f32.mrb[15].mxu0  ;;  %v913_v9 = vpop.f32.mrb[13].mxu1 }
 0x1fb   :  { %v983_v2 = vmul.f32 %v1857_v30, %v963_v0  ;;  %v949_v37 = vmul.f32 0.1, %v841_v1  ;;  %v912_v42 = vadd.f32 %v911_v5, %v735_v57  ;;  %v845_v46 = vadd.f32 %v844_v8, %v740_v6  ;;  %v915_v48 = vpop.f32.mrb[14].mxu1 }
 0x1fc   :  { %v994_v51 = vpack.c.bf16 %v982_v15, %v978_v7  ;;  %v964_v53 = vmax.f32 %v839_v23, %v948_v16  ;;  %v952_v28 = vmul.f32 0.1, %v843_v17  ;;  %v914_v29 = vadd.f32 %v913_v9, %v735_v57  ;;  %v917_v31 = vpop.f32.mrb[15].mxu1 }
 0x1fd   :  { %v965_v52 = vmax.f32 %v841_v1, %v949_v37  ;;  %v950_v54 = vmul.f32 0.1, %v912_v42  ;;  %v953_v36 = vmul.f32 0.1, %v845_v46  ;;  %v916_v39 = vadd.f32 %v915_v48, %v740_v6 }
 0x1fe   :  { %v984_v19 = vmul.f32 %v1849_v11, %v964_v53  ;;  %v968_v20 = vmax.f32 %v843_v17, %v952_v28  ;;  %v951_v21 = vmul.f32 0.1, %v914_v29  ;;  %v918_v33 = vadd.f32 %v917_v31, %v740_v6 }
 0x1ff   :  { %v985_v25 = vmul.f32 %v1851_v4, %v965_v52  ;;  %v966_v47 = vmax.f32 %v912_v42, %v950_v54  ;;  %v969_v26 = vmax.f32 %v845_v46, %v953_v36  ;;  %v954_v40 = vmul.f32 0.1, %v916_v39 }
 0x200   :  { %v988_v43 = vmul.f32 %v1849_v11, %v968_v20  ;;  %v967_v44 = vmax.f32 %v914_v29, %v951_v21  ;;  %v955_v49 = vmul.f32 0.1, %v918_v33  ;;  %v993_v35 = vpack.c.bf16 %v981_v27, %v977_v58 }
 0x201   :  { %v986_v18 = vmul.f32 %v1854_v32, %v966_v47  ;;  %v989_v50 = vmul.f32 %v1851_v4, %v969_v26  ;;  %v970_v45 = vmax.f32 %v916_v39, %v954_v40  ;;  %v995_v55 = vpack.c.bf16 %v983_v2, %v979_v62  ;;  %v745_v4 = vpop.permute.xlu1 %744 }
 0x202   :  { %v996_v56 = vpack.c.bf16 %v988_v43, %v984_v19  ;;  %v987_v57 = vmul.f32 %v1857_v30, %v967_v44  ;;  %v971_v59 = vmax.f32 %v918_v33, %v955_v49  ;;  %1000 = vmatprep.subr.bf16.mxu0 %v993_v35 }
 0x203   :  { %v990_v60 = vmul.f32 %v1854_v32, %v970_v45  ;;  %1001 = vmatpush1.bf16.msra.mxu0 %v992_v12  ;;  %1053 = vmatprep.subr.bf16.mxu1 %v995_v55  ;;  %v997_v61 = vpack.c.bf16 %v989_v50, %v985_v25 }
 0x204   :  { %v991_v11 = vmul.f32 %v1857_v30, %v971_v59  ;;  %1054 = vmatpush1.bf16.msra.mxu1 %v994_v51  ;;  %v750_v30 = vpop.permute.xlu0 %749 }
 0x205   :  { %v998_v58 = vpack.c.bf16 %v990_v60, %v986_v18  ;;  %1002 = vmatprep.subr.bf16.mxu0 %v997_v61  ;;  %v755_v48 = vpop.permute.xlu1 %754 }
 0x206   :  { %v999_v38 = vpack.c.bf16 %v991_v11, %v987_v57 }
 0x207   :  { %1003 = vmatpush1.bf16.msra.mxu0 %v996_v56 }
 0x208   :  { %1055 = vmatprep.subr.bf16.mxu1 %v999_v38  ;;  %v760_v31 = vpop.permute.xlu0 %759 }
 0x209   :  { %1056 = vmatpush1.bf16.msra.mxu1 %v998_v58 }
 0x20a   :  { %1343 = vmatmul.mubr.msk.bf16.vlgmr.msra.gmra.mrb[16].mxu0 %vm91_vm1, %v1830_v3 }
 0x20b   :  { %1042 = vmatprep.mubr.bf16.mxu0 %v1499_v10 }
 0x20c   :  { %1345 = vmatmul.mubr.msk.bf16.vlgmr.msra.gmra.mrb[16].mxu1 %vm91_vm1, %v1830_v3 }
 0x20d   :  { %1095 = vmatprep.mubr.bf16.mxu1 %v1499_v10 }
 0x212   :  { %1344 = vmatmul.mubr.msk.bf16.gmra.mrb[20].mxu0 %vm91_vm1, %v1841_v34 }
 0x213   :  { %1178 = vmatprep.mubr.bf16.mxu0 %v1499_v10 }
 0x214   :  { %1346 = vmatmul.mubr.msk.bf16.gmra.mrb[20].mxu1 %vm91_vm1, %v1841_v34 }
 0x215   :  { %1231 = vmatprep.mubr.bf16.mxu1 %v1499_v10 }
 0x2dd   :  { %v1034_v32 = vpop.f32.mrb[16].mxu0 }
 0x2de   :  { %v1351_v6 = vadd.f32 %v1034_v32, %v745_v4  ;;  %v1036_v41 = vpop.f32.mrb[17].mxu0 }
 0x2df   :  { %v1352_v7 = vadd.f32 %v1036_v41, %v745_v4  ;;  %v1038_v22 = vpop.f32.mrb[18].mxu0  ;;  %v1087_v3 = vpop.f32.mrb[16].mxu1 }
 0x2e0   :  { %v1106_v23 = vmul.f32 0.1, %v1351_v6  ;;  %v1353_v24 = vadd.f32 %v1038_v22, %v750_v30  ;;  %v1359_v27 = vadd.f32 %v1087_v3, %v745_v4  ;;  %v1040_v62 = vpop.f32.mrb[19].mxu0  ;;  %v1089_v0 = vpop.f32.mrb[17].mxu1 }
 0x2e1   :  { %v1107_v1 = vmul.f32 0.1, %v1352_v7  ;;  %v1354_v63 = vadd.f32 %v1040_v62, %v750_v30  ;;  %v1360_v5 = vadd.f32 %v1089_v0, %v745_v4  ;;  %v1091_v12 = vpop.f32.mrb[18].mxu1 }
 0x2e2   :  { %v1110_v34 = vmul.f32 0.1, %v1353_v24  ;;  %v1108_v15 = vmul.f32 0.1, %v1359_v27  ;;  %v1361_v16 = vadd.f32 %v1091_v12, %v750_v30  ;;  %v1093_v17 = vpop.f32.mrb[19].mxu1  ;;  %v1122_v37 = vmax.f32 %v1351_v6, %v1106_v23 }
 0x2e3   :  { %v1111_v8 = vmul.f32 0.1, %v1354_v63  ;;  %v1109_v9 = vmul.f32 0.1, %v1360_v5  ;;  %v1362_v2 = vadd.f32 %v1093_v17, %v750_v30  ;;  %v1123_v51 = vmax.f32 %v1352_v7, %v1107_v1 }
 0x2e4   :  { %v1126_v42 = vmax.f32 %v1353_v24, %v1110_v34  ;;  %v1112_v46 = vmul.f32 0.1, %v1361_v16  ;;  %v1124_v54 = vmax.f32 %v1359_v27, %v1108_v15  ;;  %v1260_v34 = vpop.permute.xlu0 %1259 }
 0x2e5   :  { %v1127_v53 = vmax.f32 %v1354_v63, %v1111_v8  ;;  %v1113_v28 = vmul.f32 0.1, %v1362_v2  ;;  %v1044_v29 = vpop.f32.mrb[20].mxu0  ;;  %v1125_v20 = vmax.f32 %v1360_v5, %v1109_v9  ;;  %v1255_v5 = vpop.permute.xlu1 %1254 }
 0x2e6   :  { %v1138_v52 = vpack.c.bf16 %v1126_v42, %v1122_v37  ;;  %v1128_v36 = vmax.f32 %v1361_v16, %v1112_v46  ;;  %v1355_v39 = vadd.f32 %v1044_v29, %v755_v48  ;;  %v1046_v19 = vpop.f32.mrb[21].mxu0 }
 0x2e7   :  { %v1129_v21 = vmax.f32 %v1362_v2, %v1113_v28  ;;  %v1356_v33 = vadd.f32 %v1046_v19, %v755_v48  ;;  %v1048_v25 = vpop.f32.mrb[22].mxu0  ;;  %v1097_v47 = vpop.f32.mrb[20].mxu1  ;;  %v1139_v26 = vpack.c.bf16 %v1127_v53, %v1123_v51 }
 0x2e8   :  { %v1140_v40 = vpack.c.bf16 %v1128_v36, %v1124_v54  ;;  %v1114_v43 = vmul.f32 0.1, %v1355_v39  ;;  %v1357_v44 = vadd.f32 %v1048_v25, %v760_v31  ;;  %v1363_v49 = vadd.f32 %v1097_v47, %v755_v48  ;;  %v1050_v35 = vpop.f32.mrb[23].mxu0  ;;  %v1099_v18 = vpop.f32.mrb[21].mxu1 }
 0x2e9   :  { %v1115_v50 = vmul.f32 0.1, %v1356_v33  ;;  %v1358_v45 = vadd.f32 %v1050_v35, %v760_v31  ;;  %v1364_v55 = vadd.f32 %v1099_v18, %v755_v48  ;;  %v1101_v56 = vpop.f32.mrb[22].mxu1  ;;  %1146 = vmatprep.subr.bf16.mxu0 %v1139_v26  ;;  %v1141_v57 = vpack.c.bf16 %v1129_v21, %v1125_v20  ;;  %v1265_v28 = vpop.permute.xlu1 %1264 }
 0x2ea   :  { %v1118_v59 = vmul.f32 0.1, %v1357_v44  ;;  %v1116_v60 = vmul.f32 0.1, %v1363_v49  ;;  %v1365_v61 = vadd.f32 %v1101_v56, %v760_v31  ;;  %v1103_v11 = vpop.f32.mrb[23].mxu1  ;;  %1147 = vmatpush1.bf16.msra.mxu0 %v1138_v52  ;;  %v1130_v32 = vmax.f32 %v1355_v39, %v1114_v43 }
 0x2eb   :  { %v1119_v58 = vmul.f32 0.1, %v1358_v45  ;;  %v1117_v38 = vmul.f32 0.1, %v1364_v55  ;;  %v1366_v4 = vadd.f32 %v1103_v11, %v760_v31  ;;  %1199 = vmatprep.subr.bf16.mxu1 %v1141_v57  ;;  %v1131_v41 = vmax.f32 %v1356_v33, %v1115_v50  ;;  %v1270_v31 = vpop.permute.xlu0 %1269 }
 0x2ec   :  { %v1134_v30 = vmax.f32 %v1357_v44, %v1118_v59  ;;  %v1120_v6 = vmul.f32 0.1, %v1365_v61  ;;  %1200 = vmatpush1.bf16.msra.mxu1 %v1140_v40  ;;  %v1132_v23 = vmax.f32 %v1363_v49, %v1116_v60 }
 0x2ed   :  { %v1135_v7 = vmax.f32 %v1358_v45, %v1119_v58  ;;  %v1121_v22 = vmul.f32 0.1, %v1366_v4  ;;  %v1133_v27 = vmax.f32 %v1364_v55, %v1117_v38 }
 0x2ee   :  { %v1142_v3 = vpack.c.bf16 %v1134_v30, %v1130_v32  ;;  %v1136_v24 = vmax.f32 %v1365_v61, %v1120_v6 }
 0x2ef   :  { %v1137_v62 = vmax.f32 %v1366_v4, %v1121_v22  ;;  %v1143_v0 = vpack.c.bf16 %v1135_v7, %v1131_v41 }
 0x2f0   :  { %v1144_v1 = vpack.c.bf16 %v1136_v24, %v1132_v23 }
 0x2f1   :  { %1148 = vmatprep.subr.bf16.mxu0 %v1143_v0  ;;  %v1145_v63 = vpack.c.bf16 %v1137_v62, %v1133_v27 }
 0x2f2   :  { %1149 = vmatpush1.bf16.msra.mxu0 %v1142_v3 }
 0x2f3   :  { %1201 = vmatprep.subr.bf16.mxu1 %v1145_v63 }
 0x2f4   :  { %1202 = vmatpush1.bf16.msra.mxu1 %v1144_v1 }
 0x2f5   :  { %1347 = vmatmul.mubr.msk.bf16.vlgmr.msra.gmra.mrb[0].mxu0 %vm91_vm1, %v1687_v13 }
 0x2f6   :  { %1188 = vmatprep.mubr.bf16.mxu0 %v1499_v10 }
 0x2f7   :  { %1349 = vmatmul.mubr.msk.bf16.vlgmr.msra.gmra.mrb[0].mxu1 %vm91_vm1, %v1687_v13 }
 0x2f8   :  { %1241 = vmatprep.mubr.bf16.mxu1 %v1499_v10 }
 0x2fd   :  { %1348 = vmatmul.mubr.msk.bf16.gmra.mrb[4].mxu0 %vm91_vm1, %v1701_v14 }
 0x2ff   :  { %1350 = vmatmul.mubr.msk.bf16.gmra.mrb[4].mxu1 %vm91_vm1, %v1701_v14 }
 0x3c8   :  { %v1180_v12 = vpop.f32.mrb[0].mxu0 }
 0x3c9   :  { %v1272_v15 = vadd.f32 %v1255_v5, %v1180_v12  ;;  %v1182_v16 = vpop.f32.mrb[1].mxu0 }
 0x3ca   :  { %v1273_v17 = vadd.f32 %v1255_v5, %v1182_v16  ;;  %v1184_v8 = vpop.f32.mrb[2].mxu0  ;;  %v1233_v9 = vpop.f32.mrb[0].mxu1 }
 0x3cb   :  { %1288 = vst [vmem:[#allocation5] sm:$0xff] %v1272_v15  ;;  %v1276_v2 = vadd.f32 %v1260_v34, %v1184_v8  ;;  %v1274_v37 = vadd.f32 %v1255_v5, %v1233_v9  ;;  %v1186_v13 = vpop.f32.mrb[3].mxu0  ;;  %v1235_v42 = vpop.f32.mrb[1].mxu1 }
 0x3cc   :  { %1289 = vst [vmem:[#allocation5 + $0x8] sm:$0xff] %v1273_v17  ;;  %v1277_v10 = vadd.f32 %v1260_v34, %v1186_v13  ;;  %v1275_v46 = vadd.f32 %v1255_v5, %v1235_v42  ;;  %v1237_v48 = vpop.f32.mrb[2].mxu1 }
 0x3cd   :  { %1292 = vst [vmem:[#allocation5 + $0x20] sm:$0xff] %v1276_v2  ;;  %1290 = vst [vmem:[#allocation5 + $0x10] sm:$0xff] %v1274_v37  ;;  %v1278_v14 = vadd.f32 %v1260_v34, %v1237_v48  ;;  %v1239_v51 = vpop.f32.mrb[3].mxu1 }
 0x3ce   :  { %1293 = vst [vmem:[#allocation5 + $0x28] sm:$0xff] %v1277_v10  ;;  %1291 = vst [vmem:[#allocation5 + $0x18] sm:$0xff] %v1275_v46  ;;  %v1279_v53 = vadd.f32 %v1260_v34, %v1239_v51 }
 0x3cf   :  { %1294 = vst [vmem:[#allocation5 + $0x30] sm:$0xff] %v1278_v14 }
 0x3d0   :  { %1295 = vst [vmem:[#allocation5 + $0x38] sm:$0xff] %v1279_v53  ;;  %v1190_v29 = vpop.f32.mrb[4].mxu0 }
 0x3d1   :  { %v1280_v52 = vadd.f32 %v1265_v28, %v1190_v29  ;;  %v1192_v54 = vpop.f32.mrb[5].mxu0 }
 0x3d2   :  { %v1281_v36 = vadd.f32 %v1265_v28, %v1192_v54  ;;  %v1194_v39 = vpop.f32.mrb[6].mxu0  ;;  %v1243_v19 = vpop.f32.mrb[4].mxu1 }
 0x3d3   :  { %1296 = vst [vmem:[#allocation5 + $0x40] sm:$0xff] %v1280_v52  ;;  %v1284_v20 = vadd.f32 %v1270_v31, %v1194_v39  ;;  %v1282_v21 = vadd.f32 %v1265_v28, %v1243_v19  ;;  %v1196_v33 = vpop.f32.mrb[7].mxu0  ;;  %v1245_v25 = vpop.f32.mrb[5].mxu1 }
 0x3d4   :  { %1297 = vst [vmem:[#allocation5 + $0x48] sm:$0xff] %v1281_v36  ;;  %v1285_v47 = vadd.f32 %v1270_v31, %v1196_v33  ;;  %v1283_v26 = vadd.f32 %v1265_v28, %v1245_v25  ;;  %v1247_v40 = vpop.f32.mrb[6].mxu1 }
 0x3d5   :  { %1300 = vst [vmem:[#allocation5 + $0x60] sm:$0xff] %v1284_v20  ;;  %1298 = vst [vmem:[#allocation5 + $0x50] sm:$0xff] %v1282_v21  ;;  %v1286_v43 = vadd.f32 %v1270_v31, %v1247_v40  ;;  %v1249_v44 = vpop.f32.mrb[7].mxu1 }
 0x3d6   :  { %1301 = vst [vmem:[#allocation5 + $0x68] sm:$0xff] %v1285_v47  ;;  %1299 = vst [vmem:[#allocation5 + $0x58] sm:$0xff] %v1283_v26  ;;  %v1287_v49 = vadd.f32 %v1270_v31, %v1249_v44 }
 0x3d7   :  { %1302 = vst [vmem:[#allocation5 + $0x70] sm:$0xff] %v1286_v43 }
 0x3d8   :  { %1303 = vst [vmem:[#allocation5 + $0x78] sm:$0xff] %v1287_v49 }
 0x3d9   :  { %1472 = shalt.err (!%p1469_p12)
}
 0x3da   :  { %s1473_s25 = scalar_lea.hbm %s1916_s4, 2048 }
 0x3db   :  { %p1474_p13 = scmp.ne.s32.totalorder %s1916_s4, %s1473_s25  ;;  %p1477_p0 = scmp.lt.u32.totalorder %s1473_s25, %s1916_s4 }
 0x3dd   :  { %p1479_p1 = pnand %p1477_p0, %p1474_p13 }
 0x3df   :  { %1482 = shalt.err (!%p1479_p1)
}
 0x3e0   :  { %s1501_s30 = smov 512   ;;  %s1502_s5 = smov 32  }
 0x3e1   :  { %1315 = dma.vmem_to_hbm [thread:$0]  %s1310_s21, 2048, %s1916_s4, [#allocation4], %s1501_s30, %s1501_s30, %s1502_s5  }
 0x3e2   :  { %1485 = dma.done.wait [#allocation4], 2048  }
 0x3e3   :  { %1486 = vsyncadd [#allocation4], 4294965248 }
 0x3e4   :  { %1319 = vsyncpa [#allocation3], 1 }
 0x3e5   :  { %1320 = vsyncpa [#allocation4], 1 }

</bundles_post_ra>
